<compile_context>
chip_gen: v7x
topology: tpu7x:2x2x1
jax: 0.10.0
libtpu: 0.0.40
codegen_flags: <defaults>
</compile_context>

<pallas_src>
import jax
import jax.numpy as jnp
from jax.experimental import pallas as pl
from jax.experimental.pallas import tpu as pltpu


def _ceil_to(x, m):
    return ((x + m - 1) // m) * m


def _vmem_tile_bytes(rows, cols, itemsize):
    # A VMEM buffer's trailing two dims are padded to the (8, 128) vreg tile.
    return _ceil_to(max(rows, 1), 8) * _ceil_to(max(cols, 1), 128) * itemsize


def _tile_footprint_bytes(tb, gI, Vp, E, N):
    """Rough per-grid-step VMEM footprint (double-buffered I/O + live intermediates)."""
    R = tb * gI
    streamed = 2 * (_vmem_tile_bytes(tb, gI, 4)        # sga indices (int32)
                    + _vmem_tile_bytes(tb, E, 4)       # emb_signal out (f32)
                    + _vmem_tile_bytes(tb, gI, 4))     # attn_wt out (f32)
    resident = 2 * (_vmem_tile_bytes(Vp, E, 2)         # embedding table (bf16)
                    + _vmem_tile_bytes(E, E, 2)        # Wk^T
                    + _vmem_tile_bytes(E, N, 2)        # Wq^T
                    + _vmem_tile_bytes(1, E, 4)
                    + _vmem_tile_bytes(1, N, 4))
    scratch = (_vmem_tile_bytes(R, Vp, 4)              # one-hot (f32 before pack)
               + _vmem_tile_bytes(R, Vp, 2)            # one-hot (bf16)
               + 3 * _vmem_tile_bytes(R, E, 4)         # embs / keys / weighted embs
               + 4 * _vmem_tile_bytes(R, N, 4)         # heads / exp / softmax / sums
               + 4 * _vmem_tile_bytes(tb, max(gI, E), 4))
    return streamed + resident + scratch


def sga_self_attn_kernel(sga_ref, tbl_ref, wk_ref, bk_ref, wq_ref, bq_ref,
                         emb_ref, attn_ref):
    tb, gI = sga_ref.shape                 # (tb, I)
    Vp, E = tbl_ref.shape
    N = wq_ref.shape[1]
    R = tb * gI

    sga = sga_ref[...]                                              # (tb, I) int32

    # ---- nn.Embedding gather, in-kernel: one-hot @ table on the MXU ----
    iota_v = jax.lax.broadcasted_iota(jnp.int32, (tb, gI, Vp), 2)
    oh_bool = sga[:, :, None] == iota_v                             # (tb, I, Vp) bool
    # f32 reshape first (I == sublane count -> layout no-op), then pack to bf16.
    onehot2 = oh_bool.astype(jnp.float32).reshape(R, Vp).astype(jnp.bfloat16)
    embs2 = jnp.dot(onehot2, tbl_ref[...],
                    preferred_element_type=jnp.float32)             # (R, E) f32

    # ---- transform2Keys: tanh(Linear E -> E), bf16 operands, f32 accumulate ----
    keys2 = jnp.tanh(
        jnp.dot(embs2.astype(jnp.bfloat16), wk_ref[...],
                preferred_element_type=jnp.float32) + bk_ref[...])  # (R, E) f32

    # ---- queryKeyMatch: Linear E -> N ----
    heads2 = jnp.dot(keys2.astype(jnp.bfloat16), wq_ref[...],
                     preferred_element_type=jnp.float32) + bq_ref[...]  # (R, N)

    heads = heads2.reshape(tb, gI, N)                               # (tb, I, N)

    # ---- padding mask: masked_fill(sga == 0, -1e9), from one-hot column 0 ----
    pad = oh_bool[:, :, 0:1]                                        # (tb, I, 1) bool
    heads = jnp.where(pad, jnp.float32(-1e9), heads)

    # ---- softmax over the gene axis (dim=1), exact divide ----
    m = jnp.max(heads, axis=1, keepdims=True)                       # (tb, 1, N)
    p = jnp.exp(heads - m)                                          # (tb, I, N)
    den = jnp.sum(p, axis=1, keepdims=True)                         # (tb, 1, N)
    A = p / den                                                     # (tb, I, N)

    # ---- outputs (2D, lane-layout, no trailing singleton dims) ----
    aw3 = jnp.sum(A, axis=2, keepdims=True)                         # (tb, I, 1)
    embs = embs2.reshape(tb, gI, E)                                 # (tb, I, E)
    emb_ref[...] = jnp.sum(aw3 * embs, axis=1)                      # (tb, E)
    attn_ref[...] = jnp.sum(A, axis=2)                              # (tb, I)


def sga_self_attn(sga, emb_table, wk, bk, wq, bq, n_head, batch_block=512):
    """sga: (B, I) int32 indices (0 = padding).
    Returns (emb_signal (B, E), attn_wt (B, I))."""
    B, I = sga.shape
    V, E = emb_table.shape
    N = n_head
    Vp = _ceil_to(V, 16)                             # bf16-friendly table row count

    # --- batch tile selection ---
    tb = max(8, (min(int(batch_block), _ceil_to(B, 8)) // 8) * 8)
    # keep >= 2 grid steps when the batch is big enough (feeds both TCs on v7x)
    if B > 64 and _ceil_to(B, tb) // tb < 2:
        tb = max(8, _ceil_to((B + 1) // 2, 8))
    # derive tile against a v7x-safe VMEM budget (64 MiB/TC there) with headroom
    vmem_budget = 40 * 1024 * 1024
    while tb > 8 and _tile_footprint_bytes(tb, I, Vp, E, N) > (3 * vmem_budget) // 4:
        tb = max(8, ((tb // 2) // 8) * 8)
    Bp = _ceil_to(B, tb)

    # Only the padded int32 index matrix is streamed per tile.
    sga_p = jnp.zeros((Bp, I), dtype=jnp.int32).at[:B, :].set(sga.astype(jnp.int32))

    # Parameters (torch Linear stores weight as (out, in) -> transpose to (in, out)).
    tbl = jnp.zeros((Vp, E), jnp.bfloat16).at[:V, :].set(emb_table.astype(jnp.bfloat16))
    wk_t = wk.T.astype(jnp.bfloat16)                 # (E, E)
    bk2 = bk.reshape(1, E).astype(jnp.float32)
    wq_t = wq.T.astype(jnp.bfloat16)                 # (E, N)
    bq2 = bq.reshape(1, N).astype(jnp.float32)

    emb_out, attn_out = pl.pallas_call(
        sga_self_attn_kernel,
        out_shape=(
            jax.ShapeDtypeStruct((Bp, E), jnp.float32),
            jax.ShapeDtypeStruct((Bp, I), jnp.float32),
        ),
        grid_spec=pltpu.PrefetchScalarGridSpec(
            num_scalar_prefetch=0,
            grid=(Bp // tb,),
            in_specs=[
                pl.BlockSpec((tb, I), lambda b: (b, 0)),     # sga indices (int32)
                pl.BlockSpec((Vp, E), lambda b: (0, 0)),     # embedding table (bf16, resident)
                pl.BlockSpec((E, E), lambda b: (0, 0)),      # Wk^T (bf16)
                pl.BlockSpec((1, E), lambda b: (0, 0)),      # bk
                pl.BlockSpec((E, N), lambda b: (0, 0)),      # Wq^T (bf16)
                pl.BlockSpec((1, N), lambda b: (0, 0)),      # bq
            ],
            out_specs=(
                pl.BlockSpec((tb, E), lambda b: (b, 0)),     # emb_signal
                pl.BlockSpec((tb, I), lambda b: (b, 0)),     # attn_wt
            ),
        ),
        compiler_params=pltpu.CompilerParams(
            dimension_semantics=("parallel",),               # megacore on v7x; neutral elsewhere
            vmem_limit_bytes=int(vmem_budget),
        ),
    )(sga_p, tbl, wk_t, bk2, wq_t, bq2)

    return emb_out[:B], attn_out[:B]


def reference(sga, emb_table, wk, bk, wq, bq, n_head):
    """Pure-JAX (f32) re-implementation of the PyTorch forward (mask=True)."""
    embs = jnp.take(emb_table, sga, axis=0)                   # (B, I, E)
    keys = jnp.tanh(embs @ wk.T + bk)                         # (B, I, E)
    heads = keys @ wq.T + bq                                  # (B, I, N)
    mask = (sga == 0)[:, :, None]
    heads = jnp.where(mask, jnp.float32(-1e9), heads)
    A = jax.nn.softmax(heads, axis=1)                         # softmax over genes
    emb = jnp.einsum('bin,bie->be', A, embs)                  # sum over heads of A^T @ embs
    attn = jnp.sum(A, axis=2)
    return emb, attn


if __name__ == "__main__":
    # Small shapes consistent with the module: batch B, I gene slots per case,
    # embedding dim E, N attention heads, sga_size distinct gene indices.
    B, I, E, N = 2, 8, 32, 4
    sga_size = 16

    key = jax.random.PRNGKey(0)
    k_emb, k_wk, k_bk, k_wq, k_bq, k_sga = jax.random.split(key, 6)

    # nn.Embedding(sga_size + 1, E, padding_idx=0): row 0 zeroed.
    # TODO(synk): gene2vec pretrained-embedding loading (file I/O) is init-time
    # only and not reproduced here; the table below plays its role.
    emb_table = jax.random.normal(k_emb, (sga_size + 1, E), dtype=jnp.float32)
    emb_table = emb_table.at[0].set(0.0)

    # nn.Linear(E, E) and nn.Linear(E, N): torch stores weight as (out, in).
    wk = jax.random.normal(k_wk, (E, E), dtype=jnp.float32) * 0.1
    bk = jax.random.normal(k_bk, (E,), dtype=jnp.float32) * 0.1
    wq = jax.random.normal(k_wq, (N, E), dtype=jnp.float32) * 0.1
    bq = jax.random.normal(k_bq, (N,), dtype=jnp.float32) * 0.1

    # SGA index matrix with some padding zeros to exercise the mask.
    sga = jax.random.randint(k_sga, (B, I), 0, sga_size + 1).astype(jnp.int32)
    sga = sga.at[0, 0].set(0)
    sga = sga.at[1, 3].set(0)

    emb_signal, attn_wt = sga_self_attn(sga, emb_table, wk, bk, wq, bq, N)
    emb_signal = jax.block_until_ready(emb_signal)
    attn_wt = jax.block_until_ready(attn_wt)

    emb_ref, attn_ref = reference(sga, emb_table, wk, bk, wq, bq, N)

    assert emb_signal.shape == (B, E) and attn_wt.shape == (B, I)
    # bf16 MXU operands are the only remaining precision loss (exact softmax divide).
    assert jnp.allclose(emb_signal, emb_ref, rtol=3e-2, atol=3e-2)
    assert jnp.allclose(attn_wt, attn_ref, rtol=3e-2, atol=3e-2)

    print("KERNEL_OK")
</pallas_src>

<mosaic_0001>
module attributes {stable_mosaic.version = 11 : i64} {
  func.func @sga_self_attn_kernel(%arg0: i32, %arg1: memref<8x8xi32, #tpu.memory_space<vmem>>, %arg2: memref<32x32xbf16, #tpu.memory_space<vmem>>, %arg3: memref<32x32xbf16, #tpu.memory_space<vmem>>, %arg4: memref<1x32xf32, #tpu.memory_space<vmem>>, %arg5: memref<32x4xbf16, #tpu.memory_space<vmem>>, %arg6: memref<1x4xf32, #tpu.memory_space<vmem>>, %arg7: memref<8x32xf32, #tpu.memory_space<vmem>>, %arg8: memref<8x8xf32, #tpu.memory_space<vmem>>) attributes {dimension_semantics = [#tpu.dimension_semantics<parallel>], iteration_bounds = array<i64: 1>, scalar_prefetch = 0 : i64, scratch_operands = 0 : i64, tpu.core_type = #tpu.core_type<tc>, window_params = [{transform_indices = @transform_0, window_bounds = array<i64: 8, 8>}, {pipeline_mode = #tpu.pipeline_mode<synchronous>, transform_indices = @transform_1, window_bounds = array<i64: 32, 32>}, {pipeline_mode = #tpu.pipeline_mode<synchronous>, transform_indices = @transform_2, window_bounds = array<i64: 32, 32>}, {pipeline_mode = #tpu.pipeline_mode<synchronous>, transform_indices = @transform_3, window_bounds = array<i64: 1, 32>}, {pipeline_mode = #tpu.pipeline_mode<synchronous>, transform_indices = @transform_4, window_bounds = array<i64: 32, 4>}, {pipeline_mode = #tpu.pipeline_mode<synchronous>, transform_indices = @transform_5, window_bounds = array<i64: 1, 4>}, {transform_indices = @transform_6, window_bounds = array<i64: 8, 32>}, {transform_indices = @transform_7, window_bounds = array<i64: 8, 8>}]} {
    %c0 = arith.constant 0 : index
    %c0_0 = arith.constant 0 : index
    %0 = vector.load %arg1[%c0, %c0_0] : memref<8x8xi32, #tpu.memory_space<vmem>>, vector<8x8xi32>
    %1 = tpu.iota {dimensions = array<i32: 2>} : vector<8x8x32xi32>
    %2 = vector.shape_cast %0 : vector<8x8xi32> to vector<8x8x1xi32>
    %3 = vector.broadcast %2 : vector<8x8x1xi32> to vector<8x8x32xi32>
    %4 = arith.cmpi eq, %3, %1 : vector<8x8x32xi32>
    %5 = arith.extui %4 : vector<8x8x32xi1> to vector<8x8x32xi32>
    %6 = arith.sitofp %5 : vector<8x8x32xi32> to vector<8x8x32xf32>
    %7 = vector.shape_cast %6 : vector<8x8x32xf32> to vector<64x32xf32>
    %8 = arith.truncf %7 : vector<64x32xf32> to vector<64x32xbf16>
    %c0_1 = arith.constant 0 : index
    %c0_2 = arith.constant 0 : index
    %9 = vector.load %arg2[%c0_1, %c0_2] : memref<32x32xbf16, #tpu.memory_space<vmem>>, vector<32x32xbf16>
    %cst = arith.constant dense<0.000000e+00> : vector<64x32xf32>
    %10 = tpu.matmul %8, %9, %cst {dimension_numbers = #tpu.dot_dimension_numbers<[1], [0], [0], [1], [0, 0, 1, 1], [], []>} : vector<64x32xbf16>, vector<32x32xbf16>, vector<64x32xf32> -> vector<64x32xf32>
    %11 = arith.truncf %10 : vector<64x32xf32> to vector<64x32xbf16>
    %c0_3 = arith.constant 0 : index
    %c0_4 = arith.constant 0 : index
    %12 = vector.load %arg3[%c0_3, %c0_4] : memref<32x32xbf16, #tpu.memory_space<vmem>>, vector<32x32xbf16>
    %cst_5 = arith.constant dense<0.000000e+00> : vector<64x32xf32>
    %13 = tpu.matmul %11, %12, %cst_5 {dimension_numbers = #tpu.dot_dimension_numbers<[1], [0], [0], [1], [0, 0, 1, 1], [], []>} : vector<64x32xbf16>, vector<32x32xbf16>, vector<64x32xf32> -> vector<64x32xf32>
    %c0_6 = arith.constant 0 : index
    %c0_7 = arith.constant 0 : index
    %14 = vector.load %arg4[%c0_6, %c0_7] : memref<1x32xf32, #tpu.memory_space<vmem>>, vector<1x32xf32>
    %15 = vector.broadcast %14 : vector<1x32xf32> to vector<64x32xf32>
    %16 = arith.addf %13, %15 : vector<64x32xf32>
    %17 = math.tanh %16 : vector<64x32xf32>
    %18 = arith.truncf %17 : vector<64x32xf32> to vector<64x32xbf16>
    %c0_8 = arith.constant 0 : index
    %c0_9 = arith.constant 0 : index
    %19 = vector.load %arg5[%c0_8, %c0_9] : memref<32x4xbf16, #tpu.memory_space<vmem>>, vector<32x4xbf16>
    %cst_10 = arith.constant dense<0.000000e+00> : vector<64x4xf32>
    %20 = tpu.matmul %18, %19, %cst_10 {dimension_numbers = #tpu.dot_dimension_numbers<[1], [0], [0], [1], [0, 0, 1, 1], [], []>} : vector<64x32xbf16>, vector<32x4xbf16>, vector<64x4xf32> -> vector<64x4xf32>
    %c0_11 = arith.constant 0 : index
    %c0_12 = arith.constant 0 : index
    %21 = vector.load %arg6[%c0_11, %c0_12] : memref<1x4xf32, #tpu.memory_space<vmem>>, vector<1x4xf32>
    %22 = vector.broadcast %21 : vector<1x4xf32> to vector<64x4xf32>
    %23 = arith.addf %20, %22 : vector<64x4xf32>
    %24 = vector.shape_cast %23 : vector<64x4xf32> to vector<8x8x4xf32>
    %25 = vector.extract_strided_slice %4 {offsets = [0, 0, 0], sizes = [8, 8, 1], strides = [1, 1, 1]} : vector<8x8x32xi1> to vector<8x8x1xi1>
    %cst_13 = arith.constant -1.000000e+09 : f32
    %26 = vector.shape_cast %25 : vector<8x8x1xi1> to vector<8x8x1xi1>
    %27 = vector.broadcast %26 : vector<8x8x1xi1> to vector<8x8x4xi1>
    %28 = vector.broadcast %cst_13 : f32 to vector<8x8x4xf32>
    %29 = arith.select %27, %28, %24 : vector<8x8x4xi1>, vector<8x8x4xf32>
    %cst_14 = arith.constant dense<0xFF800000> : vector<8x4xf32>
    %30 = vector.multi_reduction <maximumf>, %29, %cst_14 [1] : vector<8x8x4xf32> to vector<8x4xf32>
    %31 = vector.shape_cast %30 : vector<8x4xf32> to vector<8x1x4xf32>
    %32 = vector.broadcast %31 : vector<8x1x4xf32> to vector<8x8x4xf32>
    %33 = arith.subf %29, %32 : vector<8x8x4xf32>
    %34 = math.exp %33 : vector<8x8x4xf32>
    %cst_15 = arith.constant dense<0.000000e+00> : vector<8x4xf32>
    %35 = vector.multi_reduction <add>, %34, %cst_15 [1] : vector<8x8x4xf32> to vector<8x4xf32>
    %36 = vector.shape_cast %35 : vector<8x4xf32> to vector<8x1x4xf32>
    %37 = vector.broadcast %36 : vector<8x1x4xf32> to vector<8x8x4xf32>
    %38 = arith.divf %34, %37 : vector<8x8x4xf32>
    %cst_16 = arith.constant dense<0.000000e+00> : vector<8x8xf32>
    %39 = vector.multi_reduction <add>, %38, %cst_16 [2] : vector<8x8x4xf32> to vector<8x8xf32>
    %40 = vector.shape_cast %39 : vector<8x8xf32> to vector<8x8x1xf32>
    %41 = vector.shape_cast %10 : vector<64x32xf32> to vector<8x8x32xf32>
    %42 = vector.broadcast %40 : vector<8x8x1xf32> to vector<8x8x32xf32>
    %43 = arith.mulf %42, %41 : vector<8x8x32xf32>
    %cst_17 = arith.constant dense<0.000000e+00> : vector<8x32xf32>
    %44 = vector.multi_reduction <add>, %43, %cst_17 [1] : vector<8x8x32xf32> to vector<8x32xf32>
    %c0_18 = arith.constant 0 : index
    %c0_19 = arith.constant 0 : index
    %45 = vector.load %arg7[%c0_18, %c0_19] : memref<8x32xf32, #tpu.memory_space<vmem>>, vector<8x32xf32>
    tpu.vector_store %arg7[%c0_18, %c0_19], %44 {strides = array<i32>} : memref<8x32xf32, #tpu.memory_space<vmem>>, vector<8x32xf32>,
    %cst_20 = arith.constant dense<0.000000e+00> : vector<8x8xf32>
    %46 = vector.multi_reduction <add>, %38, %cst_20 [2] : vector<8x8x4xf32> to vector<8x8xf32>
    %c0_21 = arith.constant 0 : index
    %c0_22 = arith.constant 0 : index
    %47 = vector.load %arg8[%c0_21, %c0_22] : memref<8x8xf32, #tpu.memory_space<vmem>>, vector<8x8xf32>
    tpu.vector_store %arg8[%c0_21, %c0_22], %46 {strides = array<i32>} : memref<8x8xf32, #tpu.memory_space<vmem>>, vector<8x8xf32>,
    return
  }
  func.func @transform_0(%arg0: i32) -> (i32, i32) {
    %c0_i32 = arith.constant 0 : i32
    %c0_i32_0 = arith.constant 0 : i32
    return %arg0, %c0_i32 : i32, i32
  }
  func.func @transform_1(%arg0: i32) -> (i32, i32) {
    %c0_i32 = arith.constant 0 : i32
    %c0_i32_0 = arith.constant 0 : i32
    %c0_i32_1 = arith.constant 0 : i32
    return %c0_i32, %c0_i32_0 : i32, i32
  }
  func.func @transform_2(%arg0: i32) -> (i32, i32) {
    %c0_i32 = arith.constant 0 : i32
    %c0_i32_0 = arith.constant 0 : i32
    %c0_i32_1 = arith.constant 0 : i32
    return %c0_i32, %c0_i32_0 : i32, i32
  }
  func.func @transform_3(%arg0: i32) -> (i32, i32) {
    %c0_i32 = arith.constant 0 : i32
    %c0_i32_0 = arith.constant 0 : i32
    %c0_i32_1 = arith.constant 0 : i32
    return %c0_i32, %c0_i32_0 : i32, i32
  }
  func.func @transform_4(%arg0: i32) -> (i32, i32) {
    %c0_i32 = arith.constant 0 : i32
    %c0_i32_0 = arith.constant 0 : i32
    %c0_i32_1 = arith.constant 0 : i32
    return %c0_i32, %c0_i32_0 : i32, i32
  }
  func.func @transform_5(%arg0: i32) -> (i32, i32) {
    %c0_i32 = arith.constant 0 : i32
    %c0_i32_0 = arith.constant 0 : i32
    %c0_i32_1 = arith.constant 0 : i32
    return %c0_i32, %c0_i32_0 : i32, i32
  }
  func.func @transform_6(%arg0: i32) -> (i32, i32) {
    %c0_i32 = arith.constant 0 : i32
    %c0_i32_0 = arith.constant 0 : i32
    return %arg0, %c0_i32 : i32, i32
  }
  func.func @transform_7(%arg0: i32) -> (i32, i32) {
    %c0_i32 = arith.constant 0 : i32
    %c0_i32_0 = arith.constant 0 : i32
    return %arg0, %c0_i32 : i32, i32
  }
}

</mosaic_0001>

<bundles_post_ra>
// kernel: tpu_custom_call.1
= control target key start
LH: loop header
LB: loop body
LE: loop exit
PB: predicated region body
PF: predicated region fallthrough
CT: control target
= control target key end

     0   :  { %13 = vsyncpa [#allocation3], 0  ;;  %s1401_s0 = inlined_call_operand.hbm [shape: s32[8,8], index: 0, kind: input, shape index: {}]   ;;  %s1402_s1 = inlined_call_operand.vmem [shape: bf16[32,32], index: 1, kind: input, shape index: {}]   ;;  %s1403_s2 = inlined_call_operand.hbm [shape: bf16[32,32], index: 2, kind: input, shape index: {}]   ;;  %s1404_s3 = inlined_call_operand.vmem [shape: f32[1,32], index: 3, kind: input, shape index: {}]   ;;  %s1405_s4 = inlined_call_operand.vmem [shape: bf16[32,4], index: 4, kind: input, shape index: {}]   ;;  %s1406_s5 = inlined_call_operand.vmem [shape: f32[1,4], index: 5, kind: input, shape index: {}]   ;;  %s1407_s6 = inlined_call_operand.hbm [shape: f32[8,32], index: 6, kind: output, shape index: {0}]   ;;  %s1408_s7 = inlined_call_operand.hbm [shape: f32[8,8], index: 7, kind: output, shape index: {1}]  }
   0x1   :  { %14 = vsyncpa [#allocation6], 0 }
   0x2   :  { %15 = vsyncpa [#allocation4], 0 }
   0x3   :  { %16 = vsyncpa [#allocation9], 0  ;;  %s1082_s24 = smov [#allocation2]   ;;  %s1083_s26 = smov [#allocation5]  }
   0x4   :  { %s23_s25 = sshll.u32 %s1082_s24, 4  ;;  %s34_s27 = sshll.u32 %s1083_s26, 4  ;;  %s24_s25 = int_to_ptr.vmem [resolvable:$true] %s23_s25  ;;  %s1130_s27 = int_to_ptr.vmem [resolvable:$true] %s34_s27 }
   0x5   :  { %s986_s30 = scalar_lea.hbm %s1401_s0, 128 }
   0x6   :  { %p987_p0 = scmp.ne.s32.totalorder %s1401_s0, %s986_s30  ;;  %p990_p1 = scmp.lt.u32.totalorder %s986_s30, %s1401_s0 }
   0x8   :  { %p992_p2 = pnand %p990_p1, %p987_p0 }
   0xa   :  { %995 = shalt.err (!%p992_p2)
}
   0xb   :  { %s996_s12 = scalar_lea.vmem %s24_s25, 128  ;;  %p1001_p4 = scmp.lt.s32.totalorder %s24_s25, %s24_s25 }
   0xc   :  { %p997_p3 = scmp.ne.s32.totalorder %s24_s25, %s996_s12  ;;  %p1002_p5 = scmp.lt.s32.totalorder %s996_s12, %s996_s12 }
   0xe   :  { %p1003_p6 = por %p1002_p5, %p1001_p4 }
  0x10   :  { %p1004_p7 = pnand %p1003_p6, %p997_p3 }
  0x12   :  { %1007 = shalt.err (!%p1004_p7)
}
  0x13   :  { %26 = dma.hbm_to_vmem [thread:$0]  %s1401_s0, 128, %s24_s25, [#allocation3]  }
  0x14   :  { %s1008_s17 = scalar_lea.hbm %s1403_s2, 256 }
  0x15   :  { %p1009_p8 = scmp.ne.s32.totalorder %s1403_s2, %s1008_s17  ;;  %p1012_p9 = scmp.lt.u32.totalorder %s1008_s17, %s1403_s2 }
  0x17   :  { %p1014_p10 = pnand %p1012_p9, %p1009_p8 }
  0x19   :  { %1017 = shalt.err (!%p1014_p10)
}
  0x1a   :  { %s1018_s22 = scalar_lea.vmem %s1130_s27, 256  ;;  %p1023_p12 = scmp.lt.s32.totalorder %s1130_s27, %s1130_s27 }
  0x1b   :  { %p1019_p11 = scmp.ne.s32.totalorder %s1130_s27, %s1018_s22  ;;  %p1024_p13 = scmp.lt.s32.totalorder %s1018_s22, %s1018_s22 }
  0x1d   :  { %p1025_p0 = por %p1024_p13, %p1023_p12 }
  0x1f   :  { %p1026_p1 = pnand %p1025_p0, %p1019_p11 }
  0x21   :  { %1029 = shalt.err (!%p1026_p1)
}
  0x22   :  { %s1084_s0 = smov 64   ;;  %s1085_s23 = smov 4  }
  0x23   :  { %40 = dma.hbm_to_vmem [thread:$0]  %s1403_s2, 256, %s1130_s27, [#allocation6], %s1084_s0, %s1084_s0, %s1085_s23  }
  0x24   :  { %1074 = dma.done.wait [#allocation3], 128  }
  0x25   :  { %1075 = vsyncadd [#allocation3], 4294967168 }
  0x26   :  { %1076 = dma.done.wait [#allocation6], 256  }
  0x27   :  { %1077 = vsyncadd [#allocation6], 4294967040  ;;  %v55_v0 = vlaneseq  ;;  %v1086_v1 = vmov 0   ;;  %v54_v7 = vld [vmem:[#allocation2] sm:$0xff]  ;;  %v933_v13 = vld [vmem:[%s1402_s1 + $0x8] sm:$0xff]   ;;  %vm157_vm2 = vcmask 261120  }
  0x28   :  { %930 = vset.pattern.permute.xlu0 %v1086_v1  ;;  %931 = vset.pattern.permute.xlu1 %v1086_v1  ;;  %v932_v11 = vld [vmem:[%s1402_s1] sm:$0xff]   ;;  %v1087_v28 = vmov 0.0   ;;  %v934_v52 = vld [vmem:[#allocation5] sm:$0xff]   ;;  %v935_v53 = vld [vmem:[#allocation5 + $0x8] sm:$0xff]   ;;  %vm491_vm9 = vcmask 31744  }
  0x29   :  { %v1163_v2 = vshrl.u32 %v55_v0, 7  ;;  %882 = vmatprep.subr.bf16.mxu0 %v932_v11  ;;  %918 = vmatprep.subr.bf16.mxu1 %v932_v11  ;;  %v1179_v22 = vand.u32 127, %v55_v0 }
  0x2a   :  { %883 = vmatpush3.bf16.msra.mxu0 %v932_v11  ;;  %920 = vmatpush3.bf16.msra.mxu1 %v932_v11 }
  0x2b   :  { %v73_v3 = vsub.s32 2, %v1163_v2  ;;  %v59_v4 = vsub.s32 0, %v1163_v2  ;;  %v80_v5 = vsub.s32 3, %v1163_v2  ;;  %v66_v6 = vsub.s32 1, %v1163_v2  ;;  %884 = vmatprep.subr.bf16.mxu0 %v933_v13  ;;  %919 = vmatprep.subr.bf16.mxu1 %v933_v13 }
  0x2c   :  { %v94_v10 = vsub.s32 5, %v1163_v2  ;;  %v87_v12 = vsub.s32 4, %v1163_v2  ;;  %v108_v18 = vsub.s32 7, %v1163_v2  ;;  %v101_v19 = vsub.s32 6, %v1163_v2 }
  0x2d   :  { %v74_v8 = vrot.slane %v54_v7, %v73_v3  ;;  %v60_v9 = vrot.slane %v54_v7, %v59_v4  ;;  %v81_v14 = vrot.slane %v54_v7, %v80_v5  ;;  %v67_v15 = vrot.slane %v54_v7, %v66_v6  ;;  %v936_v3 = vld [vmem:[%s1405_s4] sm:$0xff]   ;;  %v937_v4 = vld [vmem:[%s1405_s4 + $0x8] sm:$0xff]  }
  0x2e   :  { %v95_v16 = vrot.slane %v54_v7, %v94_v10  ;;  %v88_v17 = vrot.slane %v54_v7, %v87_v12  ;;  %885 = vmatpush3.bf16.msra.mxu0 %v933_v13  ;;  %921 = vmatpush3.bf16.msra.mxu1 %v933_v13  ;;  %v109_v20 = vrot.slane %v54_v7, %v108_v18  ;;  %v850_v5 = vld [vmem:[%s1404_s3] ss:$0 sm:$0xff] }
  0x2f   :  { %76 = vbcast.lane.b32.xlu1 %v74_v8, 256  ;;  %62 = vbcast.lane.b32.xlu0 %v60_v9, 256  ;;  %v102_v21 = vrot.slane %v54_v7, %v101_v19 }
  0x30   :  { %894 = vmatprep.subr.bf16.mxu1 %v934_v52  ;;  %906 = vmatprep.subr.bf16.mxu0 %v936_v3 }
  0x33   :  { %83 = vbcast.lane.b32.xlu1 %v81_v14, 256  ;;  %69 = vbcast.lane.b32.xlu0 %v67_v15, 256 }
  0x37   :  { %97 = vbcast.lane.b32.xlu1 %v95_v16, 256  ;;  %90 = vbcast.lane.b32.xlu0 %v88_v17, 256 }
  0x3b   :  { %111 = vbcast.lane.b32.xlu1 %v109_v20, 256  ;;  %104 = vbcast.lane.b32.xlu0 %v102_v21, 256 }
  0xa1   :  { %v77_v23 = vpop.permute.xlu1 %76  ;;  %v63_v24 = vpop.permute.xlu0 %62 }
  0xa2   :  { %vm113_vm0 = vcmp.eq.s32.totalorder %v63_v24, %v1179_v22  ;;  %vm115_vm1 = vcmp.eq.s32.totalorder %v77_v23, %v1179_v22 }
  0xa3   :  { %v121_v25 = vsel %vm113_vm0, 1, %v1086_v1  ;;  %v838_v29 = vsel %vm115_vm1, 1.0, %v1087_v28  ;;  %v836_v30 = vsel %vm113_vm0, 1.0, %v1087_v28  ;;  %v123_v39 = vsel %vm115_vm1, 1, %v1086_v1 }
  0xa4   :  { %452 = vperm.xlu0 %930, %v121_v25  }
  0xa5   :  { %v84_v26 = vpop.permute.xlu1 %83  ;;  %v70_v27 = vpop.permute.xlu0 %69 }
  0xa6   :  { %vm116_vm3 = vcmp.eq.s32.totalorder %v84_v26, %v1179_v22  ;;  %vm114_vm4 = vcmp.eq.s32.totalorder %v70_v27, %v1179_v22 }
  0xa7   :  { %v124_v31 = vsel %vm116_vm3, 1, %v1086_v1  ;;  %v839_v32 = vsel %vm116_vm3, 1.0, %v1087_v28  ;;  %v122_v33 = vsel %vm114_vm4, 1, %v1086_v1  ;;  %v837_v34 = vsel %vm114_vm4, 1.0, %v1087_v28 }
  0xa8   :  { %v138_v35 = vpack.c.bf16 %v839_v32, %v838_v29  ;;  %455 = vperm.xlu1 %931, %v122_v33   ;;  %461 = vperm.xlu0 %930, %v124_v31   ;;  %v137_v36 = vpack.c.bf16 %v837_v34, %v836_v30  ;;  %vm740_vm3 = vcmask 1041409   ;;  %vm742_vm4 = vcmask 1042434  }
  0xa9   :  { %v98_v37 = vpop.permute.xlu1 %97  ;;  %v91_v38 = vpop.permute.xlu0 %90 }
  0xaa   :  { %vm118_vm5 = vcmp.eq.s32.totalorder %v98_v37, %v1179_v22  ;;  %vm117_vm6 = vcmp.eq.s32.totalorder %v91_v38, %v1179_v22  ;;  %886 = vmatprep.mubr.msk.bf16.mxu0 %vm157_vm2, %v137_v36 }
  0xab   :  { %v126_v40 = vsel %vm118_vm5, 1, %v1086_v1  ;;  %v841_v41 = vsel %vm118_vm5, 1.0, %v1087_v28  ;;  %v840_v42 = vsel %vm117_vm6, 1.0, %v1087_v28  ;;  %887 = vmatmul.mubr.msk.bf16.vlgmr.msra.gmra.mrb[0].mxu0 %vm157_vm2, %v138_v35  ;;  %v125_v46 = vsel %vm117_vm6, 1, %v1086_v1 }
  0xac   :  { %458 = vperm.xlu1 %931, %v123_v39   ;;  %467 = vperm.xlu0 %930, %v126_v40   ;;  %v139_v43 = vpack.c.bf16 %v841_v41, %v840_v42  ;;  %v1249_v39 = vld [vmem:[%s1406_s5] ss:$0 sm:$0xff]  ;;  %vm744_vm5 = vcmask 1043459   ;;  %vm746_vm6 = vcmask 1044484   ;;  %s1088_s5 = smov [#allocation8]  }
  0xad   :  { %v112_v44 = vpop.permute.xlu1 %111  ;;  %v105_v45 = vpop.permute.xlu0 %104  ;;  %907 = vmatpush3.bf16.msra.mxu0 %v936_v3  ;;  %s822_s11 = sshll.u32 %s1088_s5, 4  ;;  %s823_s11 = int_to_ptr.vmem [resolvable:$true] %s822_s11 }
  0xae   :  { %vm120_vm7 = vcmp.eq.s32.totalorder %v112_v44, %v1179_v22  ;;  %vm119_vm8 = vcmp.eq.s32.totalorder %v105_v45, %v1179_v22  ;;  %890 = vmatprep.mubr.msk.bf16.mxu1 %vm157_vm2, %v139_v43  ;;  %908 = vmatprep.subr.bf16.mxu0 %v937_v4  ;;  %s1030_s12 = scalar_lea.vmem %s823_s11, 128  ;;  %p1035_p3 = scmp.lt.s32.totalorder %s823_s11, %s823_s11 }
  0xaf   :  { %v128_v47 = vsel %vm120_vm7, 1, %v1086_v1  ;;  %v843_v48 = vsel %vm120_vm7, 1.0, %v1087_v28  ;;  %v842_v49 = vsel %vm119_vm8, 1.0, %v1087_v28  ;;  %v127_v51 = vsel %vm119_vm8, 1, %v1086_v1  ;;  %p1031_p2 = scmp.ne.s32.totalorder %s823_s11, %s1030_s12  ;;  %p1036_p4 = scmp.lt.s32.totalorder %s1030_s12, %s1030_s12 }
  0xb0   :  { %v140_v50 = vpack.c.bf16 %v843_v48, %v842_v49  ;;  %464 = vperm.xlu1 %931, %v125_v46   ;;  %473 = vperm.xlu0 %930, %v128_v47   ;;  %vm748_vm7 = vcmask 1045509   ;;  %vm750_vm8 = vcmask 1046534  }
  0xb1   :  { %909 = vmatpush3.bf16.msra.mxu0 %v937_v4  ;;  %p1037_p5 = por %p1036_p4, %p1035_p3 }
  0xb2   :  { %891 = vmatmul.mubr.msk.bf16.vlgmr.msra.gmra.mrb[0].mxu1 %vm157_vm2, %v140_v50 }
  0xb3   :  { %895 = vmatpush3.bf16.msra.mxu1 %v934_v52  ;;  %p1038_p6 = pnand %p1037_p5, %p1031_p2 }
  0xb4   :  { %470 = vperm.xlu1 %931, %v127_v51   ;;  %896 = vmatprep.subr.bf16.mxu1 %v935_v53 }
  0xb7   :  { %897 = vmatpush3.bf16.msra.mxu1 %v935_v53 }
 0x123   :  { %v453_v35 = vpop.permute.xlu0 %452 }
 0x124   :  { %vm475_vm11 = vcmp.eq.s32.totalorder %v453_v35, 1 }
 0x127   :  { %v456_v36 = vpop.permute.xlu1 %455  ;;  %v462_v37 = vpop.permute.xlu0 %461 }
 0x128   :  { %vm478_vm12 = vcmp.eq.s32.totalorder %v462_v37, 1  ;;  %vm476_vm13 = vcmp.eq.s32.totalorder %v456_v36, 1 }
 0x12b   :  { %v459_v38 = vpop.permute.xlu1 %458  ;;  %v1251_v40 = vpop.permute.xlu0 %467 }
 0x12c   :  { %vm477_vm10 = vcmp.eq.s32.totalorder %v459_v38, 1  ;;  %vm480_vm0 = vcmp.eq.s32.totalorder %v1251_v40, 1 }
 0x12f   :  { %v465_v42 = vpop.permute.xlu1 %464 }
 0x130   :  { %vm479_vm14 = vcmp.eq.s32.totalorder %v465_v42, 1 }
 0x17e   :  { %v1205_v54 = vpop.f32.mrb[0].mxu0 }
 0x17f   :  { %v1207_v55 = vpop.f32.mrb[1].mxu0 }
 0x180   :  { %v1209_v56 = vpop.f32.mrb[2].mxu0 }
 0x181   :  { %v236_v57 = vpack.c.bf16 %v1209_v56, %v1205_v54  ;;  %v1213_v58 = vpop.f32.mrb[3].mxu0 }
 0x182   :  { %v235_v59 = vpack.c.bf16 %v1213_v58, %v1207_v55 }
 0x184   :  { %898 = vmatprep.mubr.msk.bf16.mxu1 %vm157_vm2, %v235_v59 }
 0x185   :  { %v1218_v60 = vpop.f32.mrb[0].mxu1  ;;  %899 = vmatmul.mubr.msk.bf16.vlgmr.msra.gmra.mrb[4].mxu1 %vm157_vm2, %v236_v57 }
 0x186   :  { %v1221_v61 = vpop.f32.mrb[1].mxu1 }
 0x187   :  { %v1223_v62 = vpop.f32.mrb[2].mxu1 }
 0x188   :  { %v238_v63 = vpack.c.bf16 %v1223_v62, %v1218_v60  ;;  %v1227_v0 = vpop.f32.mrb[3].mxu1 }
 0x189   :  { %v237_v1 = vpack.c.bf16 %v1227_v0, %v1221_v61 }
 0x18b   :  { %902 = vmatprep.mubr.msk.bf16.mxu1 %vm157_vm2, %v237_v1 }
 0x18d   :  { %903 = vmatmul.mubr.msk.bf16.gmra.mrb[8].mxu1 %vm157_vm2, %v238_v63  ;;  %v474_v63 = vpop.permute.xlu0 %473 }
 0x18e   :  { %vm482_vm15 = vcmp.eq.s32.totalorder %v474_v63, 1 }
 0x258   :  { %v900_v6 = vpop.f32.mrb[4].mxu1 }
 0x259   :  { %v317_v7 = vadd.f32 %v900_v6, %v850_v5  ;;  %v308_v8 = vpop.f32.mrb[5].mxu1 }
 0x25a   :  { %v309_v9 = vadd.f32 %v850_v5, %v308_v8  ;;  %v901_v10 = vpop.f32.mrb[6].mxu1 }
 0x25b   :  { %938 = vtanh.f32 %v317_v7  ;;  %v320_v11 = vadd.f32 %v901_v10, %v850_v5  ;;  %v311_v12 = vpop.f32.mrb[7].mxu1 }
 0x25c   :  { %940 = vtanh.f32 %v309_v9  ;;  %v312_v13 = vadd.f32 %v850_v5, %v311_v12 }
 0x25d   :  { %942 = vtanh.f32 %v320_v11 }
 0x25e   :  { %944 = vtanh.f32 %v312_v13 }
 0x260   :  { %v904_v14 = vpop.f32.mrb[8].mxu1 }
 0x261   :  { %v333_v15 = vadd.f32 %v904_v14, %v850_v5  ;;  %v324_v16 = vpop.f32.mrb[9].mxu1 }
 0x262   :  { %v325_v17 = vadd.f32 %v850_v5, %v324_v16  ;;  %v905_v18 = vpop.f32.mrb[10].mxu1 }
 0x263   :  { %946 = vtanh.f32 %v333_v15  ;;  %v336_v19 = vadd.f32 %v905_v18, %v850_v5  ;;  %v327_v20 = vpop.f32.mrb[11].mxu1 }
 0x264   :  { %948 = vtanh.f32 %v325_v17  ;;  %v328_v21 = vadd.f32 %v850_v5, %v327_v20  ;;  %v471_v5 = vpop.permute.xlu1 %470 }
 0x265   :  { %v939_v23 = vpop.eup %938  ;;  %950 = vtanh.f32 %v336_v19  ;;  %vm481_vm1 = vcmp.eq.s32.totalorder %v471_v5, 1 }
 0x266   :  { %v941_v24 = vpop.eup %940  ;;  %952 = vtanh.f32 %v328_v21 }
 0x267   :  { %v943_v25 = vpop.eup %942 }
 0x268   :  { %v945_v26 = vpop.eup %944  ;;  %v348_v27 = vpack.c.bf16 %v943_v25, %v939_v23 }
 0x269   :  { %v347_v28 = vpack.c.bf16 %v945_v26, %v941_v24 }
 0x26b   :  { %910 = vmatprep.mubr.msk.bf16.mxu0 %vm157_vm2, %v347_v28 }
 0x26c   :  { %911 = vmatmul.mubr.msk.bf16.vlgmr.msra.gmra.mrb[4].mxu0 %vm157_vm2, %v348_v27 }
 0x26d   :  { %v947_v29 = vpop.eup %946 }
 0x26e   :  { %v949_v30 = vpop.eup %948 }
 0x26f   :  { %v951_v31 = vpop.eup %950 }
 0x270   :  { %v953_v32 = vpop.eup %952  ;;  %v350_v33 = vpack.c.bf16 %v951_v31, %v947_v29 }
 0x271   :  { %v349_v34 = vpack.c.bf16 %v953_v32, %v949_v30 }
 0x273   :  { %914 = vmatprep.mubr.msk.bf16.mxu0 %vm157_vm2, %v349_v34 }
 0x274   :  { %915 = vmatmul.mubr.msk.bf16.gmra.mrb[8].mxu0 %vm157_vm2, %v350_v33 }
 0x33f   :  { %v912_v41 = vpop.f32.mrb[4].mxu0 }
 0x340   :  { %v429_v43 = vadd.f32 %v912_v41, %v1249_v39  ;;  %v420_v44 = vpop.f32.mrb[5].mxu0 }
 0x341   :  { %v421_v45 = vadd.f32 %v1249_v39, %v420_v44  ;;  %v913_v46 = vpop.f32.mrb[6].mxu0 }
 0x342   :  { %v1255_v47 = vsel %vm477_vm10, -1e+09, %v429_v43  ;;  %v432_v48 = vadd.f32 %v913_v46, %v1249_v39  ;;  %v423_v49 = vpop.f32.mrb[7].mxu0  ;;  %vm804_vm10 = vcmask 64512  }
 0x343   :  { %v506_v50 = vsel %vm491_vm9, %v1255_v47, -inf  ;;  %v1260_v51 = vsel %vm475_vm11, -1e+09, %v421_v45  ;;  %v424_v52 = vadd.f32 %v1249_v39, %v423_v49 }
 0x344   :  { %v507_v53 = vrot.slane %v506_v50, 4  ;;  %v492_v57 = vsel %vm491_vm9, %v1260_v51, -inf  ;;  %v1265_v59 = vsel %vm478_vm12, -1e+09, %v432_v48 }
 0x345   :  { %v493_v1 = vrot.slane %v492_v57, 4  ;;  %v513_v3 = vsel %vm491_vm9, %v1265_v59, -inf  ;;  %v1269_v4 = vsel %vm476_vm13, -1e+09, %v424_v52 }
 0x346   :  { %v508_v6 = vmax.f32 %v506_v50, %v507_v53  ;;  %v514_v7 = vrot.slane %v513_v3, 4  ;;  %v499_v8 = vsel %vm491_vm9, %v1269_v4, -inf }
 0x347   :  { %v494_v9 = vmax.f32 %v492_v57, %v493_v1  ;;  %v500_v10 = vrot.slane %v499_v8, 4  ;;  %v916_v11 = vpop.f32.mrb[8].mxu0 }
 0x348   :  { %v509_v12 = vrot.slane %v508_v6, 2  ;;  %v515_v13 = vmax.f32 %v513_v3, %v514_v7  ;;  %v445_v14 = vadd.f32 %v916_v11, %v1249_v39  ;;  %v436_v15 = vpop.f32.mrb[9].mxu0 }
 0x349   :  { %v495_v16 = vrot.slane %v494_v9, 2  ;;  %v501_v17 = vmax.f32 %v499_v8, %v500_v10  ;;  %v437_v18 = vadd.f32 %v1249_v39, %v436_v15  ;;  %v917_v19 = vpop.f32.mrb[10].mxu0 }
 0x34a   :  { %v510_v20 = vmax.f32 %v508_v6, %v509_v12  ;;  %v516_v21 = vrot.slane %v515_v13, 2  ;;  %v489_v23 = vsel %vm481_vm1, -1e+09, %v445_v14  ;;  %v448_v24 = vadd.f32 %v917_v19, %v1249_v39  ;;  %v439_v25 = vpop.f32.mrb[11].mxu0 }
 0x34b   :  { %v496_v26 = vmax.f32 %v494_v9, %v495_v16  ;;  %v502_v27 = vrot.slane %v501_v17, 2  ;;  %v534_v28 = vsel %vm491_vm9, %v489_v23, -inf  ;;  %v487_v29 = vsel %vm479_vm14, -1e+09, %v437_v18 }
 0x34c   :  { %v511_v30 = vrot.slane %v510_v20, 1  ;;  %v517_v31 = vmax.f32 %v515_v13, %v516_v21  ;;  %v535_v32 = vrot.slane %v534_v28, 4  ;;  %v520_v33 = vsel %vm491_vm9, %v487_v29, -inf }
 0x34d   :  { %v497_v34 = vrot.slane %v496_v26, 1  ;;  %v503_v35 = vmax.f32 %v501_v17, %v502_v27  ;;  %v521_v36 = vrot.slane %v520_v33, 4  ;;  %v490_v37 = vsel %vm482_vm15, -1e+09, %v448_v24 }
 0x34e   :  { %v512_v38 = vmax.f32 %v510_v20, %v511_v30  ;;  %v518_v41 = vrot.slane %v517_v31, 1  ;;  %v536_v43 = vmax.f32 %v534_v28, %v535_v32  ;;  %v541_v44 = vsel %vm491_vm9, %v490_v37, -inf }
 0x34f   :  { %v498_v45 = vmax.f32 %v496_v26, %v497_v34  ;;  %v504_v46 = vrot.slane %v503_v35, 1  ;;  %v522_v48 = vmax.f32 %v520_v33, %v521_v36  ;;  %v542_v42 = vrot.slane %v541_v44, 4 }
 0x350   :  { %v550_v49 = vsub.f32 %v1255_v47, %v512_v38  ;;  %v519_v50 = vmax.f32 %v517_v31, %v518_v41  ;;  %v537_v52 = vrot.slane %v536_v43, 2  ;;  %v440_v53 = vadd.f32 %v1249_v39, %v439_v25 }
 0x351   :  { %v548_v57 = vsub.f32 %v1260_v51, %v498_v45  ;;  %v505_v1 = vmax.f32 %v503_v35, %v504_v46  ;;  %v523_v63 = vrot.slane %v522_v48, 2  ;;  %v543_v3 = vmax.f32 %v541_v44, %v542_v42 }
 0x352   :  { %v560_v5 = vmul.f32 1.442695, %v550_v49  ;;  %v551_v6 = vsub.f32 %v1265_v59, %v519_v50  ;;  %v538_v7 = vmax.f32 %v536_v43, %v537_v52  ;;  %v488_v8 = vsel %vm480_vm0, -1e+09, %v440_v53 }
 0x353   :  { %v556_v9 = vmul.f32 1.442695, %v548_v57  ;;  %v549_v10 = vsub.f32 %v1269_v4, %v505_v1  ;;  %v524_v47 = vmax.f32 %v522_v48, %v523_v63  ;;  %v544_v11 = vrot.slane %v543_v3, 2 }
 0x354   :  { %954 = vpow2.f32 %v560_v5  ;;  %v562_v12 = vmul.f32 1.442695, %v551_v6  ;;  %v539_v39 = vrot.slane %v538_v7, 1  ;;  %v527_v51 = vsel %vm491_vm9, %v488_v8, -inf }
 0x355   :  { %956 = vpow2.f32 %v556_v9  ;;  %v558_v13 = vmul.f32 1.442695, %v549_v10  ;;  %v525_v14 = vrot.slane %v524_v47, 1  ;;  %v545_v15 = vmax.f32 %v543_v3, %v544_v11 }
 0x356   :  { %958 = vpow2.f32 %v562_v12  ;;  %v540_v59 = vmax.f32 %v538_v7, %v539_v39  ;;  %v528_v16 = vrot.slane %v527_v51, 4 }
 0x357   :  { %960 = vpow2.f32 %v558_v13  ;;  %v526_v40 = vmax.f32 %v524_v47, %v525_v14  ;;  %v546_v17 = vrot.slane %v545_v15, 1 }
 0x358   :  { %v554_v18 = vsub.f32 %v489_v23, %v540_v59  ;;  %v529_v19 = vmax.f32 %v527_v51, %v528_v16 }
 0x359   :  { %v552_v4 = vsub.f32 %v487_v29, %v526_v40  ;;  %v547_v20 = vmax.f32 %v545_v15, %v546_v17 }
 0x35a   :  { %v568_v21 = vmul.f32 1.442695, %v554_v18  ;;  %v530_v24 = vrot.slane %v529_v19, 2 }
 0x35b   :  { %v564_v25 = vmul.f32 1.442695, %v552_v4  ;;  %v555_v26 = vsub.f32 %v490_v37, %v547_v20 }
 0x35c   :  { %962 = vpow2.f32 %v568_v21  ;;  %v531_v27 = vmax.f32 %v529_v19, %v530_v24 }
 0x35d   :  { %964 = vpow2.f32 %v564_v25  ;;  %v570_v28 = vmul.f32 1.442695, %v555_v26 }
 0x35e   :  { %v1290_v30 = vpop.eup %954  ;;  %v532_v31 = vrot.slane %v531_v27, 1 }
 0x35f   :  { %v1292_v32 = vpop.eup %956  ;;  %v586_v33 = vsel %vm491_vm9, %v1290_v30, 0.0  ;;  %966 = vpow2.f32 %v570_v28 }
 0x360   :  { %v1296_v23 = vpop.eup %958  ;;  %v587_v29 = vrot.slane %v586_v33, 4  ;;  %v572_v34 = vsel %vm491_vm9, %v1292_v32, 0.0  ;;  %v533_v35 = vmax.f32 %v531_v27, %v532_v31 }
 0x361   :  { %v1300_v36 = vpop.eup %960  ;;  %v573_v37 = vrot.slane %v572_v34, 4  ;;  %v593_v38 = vsel %vm491_vm9, %v1296_v23, 0.0 }
 0x362   :  { %v588_v41 = vadd.f32 %v587_v29, %v586_v33  ;;  %v594_v43 = vrot.slane %v593_v38, 4  ;;  %v579_v44 = vsel %vm491_vm9, %v1300_v36, 0.0  ;;  %v553_v45 = vsub.f32 %v488_v8, %v533_v35 }
 0x363   :  { %v574_v46 = vadd.f32 %v573_v37, %v572_v34  ;;  %v580_v48 = vrot.slane %v579_v44, 4 }
 0x364   :  { %v595_v42 = vadd.f32 %v594_v43, %v593_v38  ;;  %v566_v49 = vmul.f32 1.442695, %v553_v45  ;;  %v589_v50 = vrot.slane %v588_v41, 2 }
 0x365   :  { %v581_v52 = vadd.f32 %v580_v48, %v579_v44  ;;  %v575_v53 = vrot.slane %v574_v46, 2 }
 0x366   :  { %v1306_v57 = vpop.eup %962  ;;  %968 = vpow2.f32 %v566_v49  ;;  %v590_v1 = vadd.f32 %v589_v50, %v588_v41  ;;  %v596_v63 = vrot.slane %v595_v42, 2 }
 0x367   :  { %v1308_v3 = vpop.eup %964  ;;  %v614_v5 = vsel %vm491_vm9, %v1306_v57, 0.0  ;;  %v576_v6 = vadd.f32 %v575_v53, %v574_v46  ;;  %v582_v7 = vrot.slane %v581_v52, 2 }
 0x368   :  { %v615_v8 = vrot.slane %v614_v5, 4  ;;  %v600_v9 = vsel %vm491_vm9, %v1308_v3, 0.0  ;;  %v591_v10 = vrot.slane %v590_v1, 1  ;;  %v597_v47 = vadd.f32 %v596_v63, %v595_v42 }
 0x369   :  { %v1314_v11 = vpop.eup %966  ;;  %v601_v12 = vrot.slane %v600_v9, 4  ;;  %v577_v39 = vrot.slane %v576_v6, 1  ;;  %v583_v51 = vadd.f32 %v582_v7, %v581_v52 }
 0x36a   :  { %v616_v13 = vadd.f32 %v615_v8, %v614_v5  ;;  %v621_v14 = vsel %vm491_vm9, %v1314_v11, 0.0  ;;  %v592_v15 = vadd.f32 %v591_v10, %v590_v1  ;;  %v598_v59 = vrot.slane %v597_v47, 1 }
 0x36b   :  { %v602_v16 = vadd.f32 %v601_v12, %v600_v9  ;;  %v622_v40 = vrot.slane %v621_v14, 4  ;;  %v578_v17 = vadd.f32 %v577_v39, %v576_v6  ;;  %v584_v18 = vrot.slane %v583_v51, 1 }
 0x36c   :  { %970 = vrcp.f32 %v592_v15  ;;  %v599_v19 = vadd.f32 %v598_v59, %v597_v47  ;;  %v617_v4 = vrot.slane %v616_v13, 2 }
 0x36d   :  { %v623_v20 = vadd.f32 %v622_v40, %v621_v14  ;;  %972 = vrcp.f32 %v578_v17  ;;  %v585_v21 = vadd.f32 %v584_v18, %v583_v51  ;;  %v603_v24 = vrot.slane %v602_v16, 2 }
 0x36e   :  { %974 = vrcp.f32 %v599_v19  ;;  %v618_v25 = vadd.f32 %v617_v4, %v616_v13  ;;  %v1339_v18 = vsub.s32 %v1179_v22, %v1163_v2 }
 0x36f   :  { %976 = vrcp.f32 %v585_v21  ;;  %v604_v26 = vadd.f32 %v603_v24, %v602_v16  ;;  %v624_v27 = vrot.slane %v623_v20, 2 }
 0x370   :  { %v969_v28 = vpop.eup %968  ;;  %v619_v31 = vrot.slane %v618_v25, 1 }
 0x371   :  { %v607_v33 = vsel %vm491_vm9, %v969_v28, 0.0  ;;  %v605_v29 = vrot.slane %v604_v26, 1  ;;  %v625_v34 = vadd.f32 %v624_v27, %v623_v20 }
 0x372   :  { %v608_v35 = vrot.slane %v607_v33, 4  ;;  %v620_v37 = vadd.f32 %v619_v31, %v618_v25 }
 0x373   :  { %v606_v38 = vadd.f32 %v605_v29, %v604_v26  ;;  %v626_v43 = vrot.slane %v625_v34, 1 }
 0x374   :  { %v609_v41 = vadd.f32 %v608_v35, %v607_v33  ;;  %978 = vrcp.f32 %v620_v37 }
 0x375   :  { %980 = vrcp.f32 %v606_v38  ;;  %v627_v1 = vadd.f32 %v626_v43, %v625_v34 }
 0x376   :  { %v971_v44 = vpop.eup %970  ;;  %v610_v45 = vrot.slane %v609_v41, 2 }
 0x377   :  { %v973_v46 = vpop.eup %972  ;;  %v633_v48 = vmul.f32 %v971_v44, %v1290_v30  ;;  %982 = vrcp.f32 %v627_v1 }
 0x378   :  { %v975_v42 = vpop.eup %974  ;;  %v629_v49 = vmul.f32 %v973_v46, %v1292_v32  ;;  %v611_v50 = vadd.f32 %v610_v45, %v609_v41 }
 0x379   :  { %v977_v52 = vpop.eup %976  ;;  %v650_v53 = vsel %vm491_vm9, %v633_v48, 0.0  ;;  %v635_v6 = vmul.f32 %v975_v42, %v1296_v23 }
 0x37a   :  { %651 = vadd.xlane.f32.xlu0 %v650_v53  ;;  %v644_v63 = vsel %vm491_vm9, %v629_v49, 0.0  ;;  %v631_v5 = vmul.f32 %v977_v52, %v1300_v36  ;;  %v612_v7 = vrot.slane %v611_v50, 1 }
 0x37b   :  { %645 = vadd.xlane.f32.xlu1 %v644_v63  ;;  %v653_v32 = vsel %vm491_vm9, %v635_v6, 0.0 }
 0x37c   :  { %v647_v8 = vsel %vm491_vm9, %v631_v5, 0.0  ;;  %v613_v30 = vadd.f32 %v612_v7, %v611_v50 }
 0x37e   :  { %v979_v9 = vpop.eup %978  ;;  %648 = vadd.xlane.f32.xlu0 %v647_v8  ;;  %984 = vrcp.f32 %v613_v30 }
 0x37f   :  { %v981_v10 = vpop.eup %980  ;;  %654 = vadd.xlane.f32.xlu1 %v653_v32  ;;  %v641_v36 = vmul.f32 %v979_v9, %v1306_v57 }
 0x380   :  { %v637_v47 = vmul.f32 %v981_v10, %v1308_v3 }
 0x381   :  { %v662_v23 = vsel %vm491_vm9, %v641_v36, 0.0  ;;  %v983_v39 = vpop.eup %982 }
 0x382   :  { %v656_v12 = vsel %vm491_vm9, %v637_v47, 0.0  ;;  %v643_v15 = vmul.f32 %v983_v39, %v1314_v11 }
 0x383   :  { %657 = vadd.xlane.f32.xlu0 %v656_v12 }
 0x384   :  { %v665_v59 = vsel %vm491_vm9, %v643_v15, 0.0 }
 0x387   :  { %663 = vadd.xlane.f32.xlu0 %v662_v23 }
 0x388   :  { %v985_v51 = vpop.eup %984 }
 0x389   :  { %v639_v13 = vmul.f32 %v985_v51, %v969_v28 }
 0x38b   :  { %v659_v14 = vsel %vm491_vm9, %v639_v13, 0.0  ;;  %vm752_vm9 = vcmask 1047559  }
 0x38c   :  { %660 = vadd.xlane.f32.xlu1 %v659_v14 }
 0x390   :  { %666 = vadd.xlane.f32.xlu1 %v665_v59 }
 0x407   :  { %v652_v3 = vpop.xlane.xlu0 %651 }
 0x408   :  { %v670_v16 = vmul.f32 %v1205_v54, %v652_v3  ;;  %v646_v40 = vpop.xlane.xlu1 %645  ;;  %v775_v38 = vrot.slane %v652_v3, %v1339_v18 }
 0x409   :  { %v668_v57 = vmul.f32 %v646_v40, %v1207_v55  ;;  %v767_v2 = vrot.slane %v646_v40, %v1339_v18 }
 0x40a   :  { %v690_v17 = vsel %vm157_vm2, %v670_v16, 0.0 }
 0x40b   :  { %v691_v19 = vrot.slane %v690_v17, 4  ;;  %v676_v4 = vsel %vm157_vm2, %v668_v57, 0.0  ;;  %v649_v11 = vpop.xlane.xlu0 %648 }
 0x40c   :  { %v677_v20 = vrot.slane %v676_v4, 4  ;;  %v669_v21 = vmul.f32 %v649_v11, %v1213_v58  ;;  %v655_v24 = vpop.xlane.xlu1 %654  ;;  %v771_v54 = vrot.slane %v649_v11, %v1339_v18 }
 0x40d   :  { %v692_v25 = vadd.f32 %v691_v19, %v690_v17  ;;  %v671_v26 = vmul.f32 %v1209_v56, %v655_v24  ;;  %v779_v45 = vrot.slane %v655_v24, %v1339_v18 }
 0x40e   :  { %v678_v55 = vadd.f32 %v677_v20, %v676_v4  ;;  %v683_v27 = vsel %vm157_vm2, %v669_v21, 0.0  ;;  %v796_v37 = vsel %vm740_vm3, %v771_v54, %v767_v2 }
 0x40f   :  { %v693_v28 = vrot.slane %v692_v25, 2  ;;  %v684_v22 = vrot.slane %v683_v27, 4  ;;  %v697_v31 = vsel %vm157_vm2, %v671_v26, 0.0  ;;  %v797_v42 = vsel %vm742_vm4, %v775_v38, %v796_v37 }
 0x410   :  { %v679_v33 = vrot.slane %v678_v55, 2  ;;  %v698_v29 = vrot.slane %v697_v31, 4  ;;  %v658_v58 = vpop.xlane.xlu0 %657  ;;  %v798_v8 = vsel %vm744_vm5, %v779_v45, %v797_v42 }
 0x411   :  { %v694_v34 = vadd.f32 %v693_v28, %v692_v25  ;;  %v685_v35 = vadd.f32 %v684_v22, %v683_v27  ;;  %v672_v56 = vmul.f32 %v658_v58, %v1221_v61  ;;  %v783_v50 = vrot.slane %v658_v58, %v1339_v18 }
 0x412   :  { %v680_v41 = vadd.f32 %v679_v33, %v678_v55  ;;  %v699_v43 = vadd.f32 %v698_v29, %v697_v31 }
 0x413   :  { %v686_v44 = vrot.slane %v685_v35, 2  ;;  %v704_v46 = vsel %vm157_vm2, %v672_v56, 0.0  ;;  %v695_v53 = vrot.slane %v694_v34, 1  ;;  %v799_v10 = vsel %vm746_vm6, %v783_v50, %v798_v8 }
 0x414   :  { %v700_v48 = vrot.slane %v699_v43, 2  ;;  %v705_v49 = vrot.slane %v704_v46, 4  ;;  %v664_v52 = vpop.xlane.xlu0 %663  ;;  %v681_v61 = vrot.slane %v680_v41, 1 }
 0x415   :  { %v687_v1 = vadd.f32 %v686_v44, %v685_v35  ;;  %v674_v63 = vmul.f32 %v1218_v60, %v664_v52  ;;  %v696_v12 = vadd.f32 %v695_v53, %v694_v34  ;;  %v791_v60 = vrot.slane %v664_v52, %v1339_v18 }
 0x416   :  { %v701_v5 = vadd.f32 %v700_v48, %v699_v43  ;;  %v706_v6 = vadd.f32 %v705_v49, %v704_v46  ;;  %v682_v36 = vadd.f32 %v681_v61, %v680_v41 }
 0x417   :  { %v688_v7 = vrot.slane %v687_v1, 1  ;;  %v718_v30 = vsel %vm157_vm2, %v674_v63, 0.0 }
 0x418   :  { %v702_v9 = vrot.slane %v701_v5, 1  ;;  %v707_v32 = vrot.slane %v706_v6, 2  ;;  %v719_v47 = vrot.slane %v718_v30, 4 }
 0x419   :  { %v689_v23 = vadd.f32 %v688_v7, %v687_v1  ;;  %v661_v39 = vpop.xlane.xlu1 %660 }
 0x41a   :  { %v703_v51 = vadd.f32 %v702_v9, %v701_v5  ;;  %v708_v13 = vadd.f32 %v707_v32, %v706_v6  ;;  %v673_v14 = vmul.f32 %v661_v39, %v1227_v0  ;;  %v787_v15 = vrot.slane %v661_v39, %v1339_v18 }
 0x41b   :  { %v741_v59 = vsel %vm740_vm3, %v689_v23, %v682_v36  ;;  %v720_v3 = vadd.f32 %v719_v47, %v718_v30 }
 0x41c   :  { %v743_v16 = vsel %vm742_vm4, %v696_v12, %v741_v59  ;;  %v709_v40 = vrot.slane %v708_v13, 1  ;;  %v711_v57 = vsel %vm157_vm2, %v673_v14, 0.0  ;;  %v800_v17 = vsel %vm748_vm7, %v787_v15, %v799_v10 }
 0x41d   :  { %v745_v19 = vsel %vm744_vm5, %v703_v51, %v743_v16  ;;  %v712_v4 = vrot.slane %v711_v57, 4  ;;  %v721_v11 = vrot.slane %v720_v3, 2  ;;  %v801_v0 = vsel %vm750_vm8, %v791_v60, %v800_v17  ;;  %v667_v20 = vpop.xlane.xlu1 %666 }
 0x41e   :  { %v710_v21 = vadd.f32 %v709_v40, %v708_v13  ;;  %v675_v24 = vmul.f32 %v1223_v62, %v667_v20  ;;  %v795_v25 = vrot.slane %v667_v20, %v1339_v18 }
 0x41f   :  { %v713_v54 = vadd.f32 %v712_v4, %v711_v57  ;;  %v722_v26 = vadd.f32 %v721_v11, %v720_v3 }
 0x420   :  { %v725_v55 = vsel %vm157_vm2, %v675_v24, 0.0  ;;  %v747_v27 = vsel %vm746_vm6, %v710_v21, %v745_v19  ;;  %v802_v28 = vsel %vm752_vm9, %v795_v25, %v801_v0 }
 0x421   :  { %v714_v2 = vrot.slane %v713_v54, 2  ;;  %v726_v22 = vrot.slane %v725_v55, 4  ;;  %805 = vst.msk [vmem:[#allocation8] sm:$0xff] %vm804_vm10, %v802_v28  ;;  %v723_v31 = vrot.slane %v722_v26, 1 }
 0x422   :  { %1041 = shalt.err (!%p1038_p6)
}
 0x423   :  { %s1042_s15 = scalar_lea.hbm %s1408_s7, 128 }
 0x424   :  { %p1043_p7 = scmp.ne.s32.totalorder %s1408_s7, %s1042_s15  ;;  %p1046_p8 = scmp.lt.u32.totalorder %s1042_s15, %s1408_s7 }
 0x426   :  { %p1048_p9 = pnand %p1046_p8, %p1043_p7 }
 0x428   :  { %1051 = shalt.err (!%p1048_p9)
}
 0x429   :  { %825 = dma.vmem_to_hbm [thread:$0]  %s823_s11, 128, %s1408_s7, [#allocation9]   ;;  %v715_v62 = vadd.f32 %v714_v2, %v713_v54  ;;  %v727_v18 = vadd.f32 %v726_v22, %v725_v55  ;;  %v724_v58 = vadd.f32 %v723_v31, %v722_v26 }
 0x42a   :  { %s1089_s22 = smov [#allocation7]  }
 0x42b   :  { %v716_v33 = vrot.slane %v715_v62, 1  ;;  %v728_v29 = vrot.slane %v727_v18, 2  ;;  %s812_s0 = sshll.u32 %s1089_s22, 4  ;;  %s813_s0 = int_to_ptr.vmem [resolvable:$true] %s812_s0 }
 0x42c   :  { %s1052_s7 = scalar_lea.vmem %s813_s0, 128  ;;  %p1057_p11 = scmp.lt.s32.totalorder %s813_s0, %s813_s0 }
 0x42d   :  { %v717_v34 = vadd.f32 %v716_v33, %v715_v62  ;;  %v729_v35 = vadd.f32 %v728_v29, %v727_v18  ;;  %p1053_p10 = scmp.ne.s32.totalorder %s813_s0, %s1052_s7  ;;  %p1058_p12 = scmp.lt.s32.totalorder %s1052_s7, %s1052_s7 }
 0x42f   :  { %v730_v37 = vrot.slane %v729_v35, 1  ;;  %v749_v56 = vsel %vm748_vm7, %v717_v34, %v747_v27  ;;  %p1059_p13 = por %p1058_p12, %p1057_p11 }
 0x430   :  { %v751_v38 = vsel %vm750_vm8, %v724_v58, %v749_v56 }
 0x431   :  { %v731_v41 = vadd.f32 %v730_v37, %v729_v35  ;;  %p1060_p0 = pnand %p1059_p13, %p1053_p10 }
 0x433   :  { %v753_v43 = vsel %vm752_vm9, %v731_v41, %v751_v38 }
 0x434   :  { %755 = vst.msk [vmem:[#allocation7] sm:$0xff] %vm157_vm2, %v753_v43 }
 0x435   :  { %1063 = shalt.err (!%p1060_p0)
}
 0x436   :  { %s1064_s25 = scalar_lea.hbm %s1407_s6, 128 }
 0x437   :  { %p1065_p1 = scmp.ne.s32.totalorder %s1407_s6, %s1064_s25  ;;  %p1068_p2 = scmp.lt.u32.totalorder %s1064_s25, %s1407_s6 }
 0x439   :  { %p1070_p3 = pnand %p1068_p2, %p1065_p1 }
 0x43b   :  { %1073 = shalt.err (!%p1070_p3)
}
 0x43c   :  { %815 = dma.vmem_to_hbm [thread:$0]  %s813_s0, 128, %s1407_s6, [#allocation4]  }
 0x43d   :  { %1078 = dma.done.wait [#allocation4], 128  }
 0x43e   :  { %1079 = vsyncadd [#allocation4], 4294967168 }
 0x43f   :  { %1080 = dma.done.wait [#allocation9], 128  }
 0x440   :  { %1081 = vsyncadd [#allocation9], 4294967168 }
 0x441   :  { %832 = vsyncpa [#allocation3], 1 }
 0x442   :  { %833 = vsyncpa [#allocation6], 1 }
 0x443   :  { %834 = vsyncpa [#allocation4], 1 }
 0x444   :  { %835 = vsyncpa [#allocation9], 1 }

</bundles_post_ra>
